<compile_context>
chip_gen: v7x
topology: tpu7x:2x2x1
jax: 0.10.0
libtpu: 0.0.40
codegen_flags: <defaults>
</compile_context>

<pallas_src>
import jax
import jax.numpy as jnp
from jax.experimental import pallas as pl
from jax.experimental.pallas import tpu as pltpu

BATCH = 4
IN_FEATURES = 8
OUT_FEATURES = 8


def linear_kernel(x_ref, wt_ref, b_ref, o_ref):
    # x_ref : (BATCH, IN_FEATURES)       in VMEM
    # wt_ref: (IN_FEATURES, OUT_FEATURES) in VMEM  — MXU-ready, no transpose
    # b_ref : (1, OUT_FEATURES)          in VMEM
    # o_ref : (BATCH, OUT_FEATURES)
    y = jnp.dot(x_ref[...], wt_ref[...], preferred_element_type=jnp.float32)
    o_ref[...] = (y + b_ref[...]).astype(o_ref.dtype)


def prepare_params(weight, bias):
    """One-time parameter prep (hoisted out of the per-step forward).

    weight: (OUT_FEATURES, IN_FEATURES) PyTorch layout; bias: (OUT_FEATURES,).
    Returns (W.T, bias_row) in the layouts the kernel consumes directly.
    """
    w_t = jnp.asarray(weight, dtype=jnp.float32).T              # (IN, OUT)
    b_row = jnp.asarray(bias, dtype=jnp.float32).reshape(1, -1)  # (1, OUT)
    return w_t, b_row


@jax.jit
def simple_model_forward(x, w_t, b_row):
    """Pallas equivalent of SimpleModel.forward (nn.Linear(8, 8)).

    Expects already-prepped params from `prepare_params`; the jitted body is
    a single pallas_call (no per-call packing work).
    """
    return pl.pallas_call(
        linear_kernel,
        out_shape=jax.ShapeDtypeStruct((x.shape[0], w_t.shape[1]), x.dtype),
        # No grid: single invocation, whole arrays resident in VMEM, no
        # pipeline prologue/epilogue or block bookkeeping.
        in_specs=[
            pl.BlockSpec(memory_space=pltpu.MemorySpace.VMEM),
            pl.BlockSpec(memory_space=pltpu.MemorySpace.VMEM),
            pl.BlockSpec(memory_space=pltpu.MemorySpace.VMEM),
        ],
        out_specs=pl.BlockSpec(memory_space=pltpu.MemorySpace.VMEM),
    )(x, w_t, b_row)


if __name__ == "__main__":
    key = jax.random.PRNGKey(0)
    kx, kw, kb = jax.random.split(key, 3)

    # Input matching the PyTorch script: x = torch.randn(4, 8)
    x = jax.random.normal(kx, (BATCH, IN_FEATURES), dtype=jnp.float32)

    # Deterministic init mimicking nn.Linear's uniform(-1/sqrt(in), 1/sqrt(in))
    bound = 1.0 / jnp.sqrt(jnp.float32(IN_FEATURES))
    weight = jax.random.uniform(
        kw, (OUT_FEATURES, IN_FEATURES), minval=-bound, maxval=bound,
        dtype=jnp.float32)
    bias = jax.random.uniform(
        kb, (OUT_FEATURES,), minval=-bound, maxval=bound, dtype=jnp.float32)

    # One-time parameter prep (would live at model init in a training loop).
    w_t, b_row = prepare_params(weight, bias)
    w_t, b_row = jax.block_until_ready((w_t, b_row))

    out = simple_model_forward(x, w_t, b_row)
    jax.block_until_ready(out)

    # Sanity check against plain-JAX reference (PyTorch convention y = x @ W.T + b)
    ref = x @ weight.T + bias
    assert out.shape == (BATCH, OUT_FEATURES)
    assert jnp.allclose(out, ref, atol=1e-5), "mismatch vs reference"

    print("KERNEL_OK")
</pallas_src>

<mosaic_0001>
module attributes {stable_mosaic.version = 11 : i64} {
  func.func @linear_kernel(%arg0: memref<4x8xf32, #tpu.memory_space<vmem>>, %arg1: memref<8x8xf32, #tpu.memory_space<vmem>>, %arg2: memref<1x8xf32, #tpu.memory_space<vmem>>, %arg3: memref<4x8xf32, #tpu.memory_space<vmem>>) attributes {dimension_semantics = [], scalar_prefetch = 0 : i64, scratch_operands = 0 : i64, tpu.core_type = #tpu.core_type<tc>} {
    %c0 = arith.constant 0 : index
    %c0_0 = arith.constant 0 : index
    %0 = vector.load %arg0[%c0, %c0_0] : memref<4x8xf32, #tpu.memory_space<vmem>>, vector<4x8xf32>
    %c0_1 = arith.constant 0 : index
    %c0_2 = arith.constant 0 : index
    %1 = vector.load %arg1[%c0_1, %c0_2] : memref<8x8xf32, #tpu.memory_space<vmem>>, vector<8x8xf32>
    %cst = arith.constant dense<0.000000e+00> : vector<4x8xf32>
    %2 = tpu.matmul %0, %1, %cst {dimension_numbers = #tpu.dot_dimension_numbers<[1], [0], [0], [1], [0, 0, 1, 1], [], []>} : vector<4x8xf32>, vector<8x8xf32>, vector<4x8xf32> -> vector<4x8xf32>
    %c0_3 = arith.constant 0 : index
    %c0_4 = arith.constant 0 : index
    %3 = vector.load %arg2[%c0_3, %c0_4] : memref<1x8xf32, #tpu.memory_space<vmem>>, vector<1x8xf32>
    %4 = vector.broadcast %3 : vector<1x8xf32> to vector<4x8xf32>
    %5 = arith.addf %2, %4 : vector<4x8xf32>
    %c0_5 = arith.constant 0 : index
    %c0_6 = arith.constant 0 : index
    %6 = vector.load %arg3[%c0_5, %c0_6] : memref<4x8xf32, #tpu.memory_space<vmem>>, vector<4x8xf32>
    tpu.vector_store %arg3[%c0_5, %c0_6], %5 {strides = array<i32>} : memref<4x8xf32, #tpu.memory_space<vmem>>, vector<4x8xf32>,
    return
  }
}

</mosaic_0001>

<bundles_post_ra>
// kernel: simple_model_forward.1
= control target key start
LH: loop header
LB: loop body
LE: loop exit
PB: predicated region body
PF: predicated region fallthrough
CT: control target
= control target key end

     0   :  { %8 = vsyncpa [#allocation3], 0  ;;  %s290_s0 = inlined_call_operand.hbm [shape: f32[4,8], index: 0, kind: input, shape index: {}]   ;;  %s291_s1 = inlined_call_operand.hbm [shape: f32[8,8], index: 1, kind: input, shape index: {}]   ;;  %s292_s2 = inlined_call_operand.vmem [shape: f32[1,8], index: 2, kind: input, shape index: {}]   ;;  %s293_s3 = inlined_call_operand.hbm [shape: f32[4,8], index: 3, kind: output, shape index: {}]  }
   0x1   :  { %9 = vsyncpa [#allocation6], 0 }
   0x2   :  { %10 = vsyncpa [#allocation4], 0  ;;  %s226_s12 = smov [#allocation2]   ;;  %s227_s14 = smov [#allocation5]  }
   0x3   :  { %s17_s13 = sshll.u32 %s226_s12, 4  ;;  %s27_s15 = sshll.u32 %s227_s14, 4  ;;  %s18_s13 = int_to_ptr.vmem [resolvable:$true] %s17_s13  ;;  %s28_s15 = int_to_ptr.vmem [resolvable:$true] %s27_s15 }
   0x4   :  { %s154_s18 = scalar_lea.hbm %s290_s0, 64 }
   0x5   :  { %p155_p0 = scmp.ne.s32.totalorder %s290_s0, %s154_s18  ;;  %p158_p1 = scmp.lt.u32.totalorder %s154_s18, %s290_s0 }
   0x7   :  { %p160_p2 = pnand %p158_p1, %p155_p0 }
   0x9   :  { %163 = shalt.err (!%p160_p2)
}
   0xa   :  { %s164_s23 = scalar_lea.vmem %s18_s13, 64  ;;  %p169_p4 = scmp.lt.s32.totalorder %s18_s13, %s18_s13 }
   0xb   :  { %p165_p3 = scmp.ne.s32.totalorder %s18_s13, %s164_s23  ;;  %p170_p5 = scmp.lt.s32.totalorder %s164_s23, %s164_s23 }
   0xd   :  { %p171_p6 = por %p170_p5, %p169_p4 }
   0xf   :  { %p172_p7 = pnand %p171_p6, %p165_p3 }
  0x11   :  { %175 = shalt.err (!%p172_p7)
}
  0x12   :  { %20 = dma.hbm_to_vmem [thread:$0]  %s290_s0, 64, %s18_s13, [#allocation3]  }
  0x13   :  { %s176_s28 = scalar_lea.hbm %s291_s1, 128 }
  0x14   :  { %p177_p8 = scmp.ne.s32.totalorder %s291_s1, %s176_s28  ;;  %p180_p9 = scmp.lt.u32.totalorder %s176_s28, %s291_s1 }
  0x16   :  { %p182_p10 = pnand %p180_p9, %p177_p8 }
  0x18   :  { %185 = shalt.err (!%p182_p10)
}
  0x19   :  { %s186_s6 = scalar_lea.vmem %s28_s15, 128  ;;  %p191_p12 = scmp.lt.s32.totalorder %s28_s15, %s28_s15 }
  0x1a   :  { %p187_p11 = scmp.ne.s32.totalorder %s28_s15, %s186_s6  ;;  %p192_p13 = scmp.lt.s32.totalorder %s186_s6, %s186_s6 }
  0x1c   :  { %p193_p0 = por %p192_p13, %p191_p12 }
  0x1e   :  { %p194_p1 = pnand %p193_p0, %p187_p11 }
  0x20   :  { %197 = shalt.err (!%p194_p1)
}
  0x21   :  { %30 = dma.hbm_to_vmem [thread:$0]  %s291_s1, 128, %s28_s15, [#allocation6]  }
  0x22   :  { %220 = dma.done.wait [#allocation3], 64  }
  0x23   :  { %221 = vsyncadd [#allocation3], 4294967232 }
  0x24   :  { %222 = dma.done.wait [#allocation6], 128  }
  0x25   :  { %223 = vsyncadd [#allocation6], 4294967168  ;;  %v228_v0 = vmov 0.0   ;;  %vm229_vm0 = vmmov 0   ;;  %vm48_vm1 = vcmask 64512   ;;  %v40_v1 = vld [vmem:[#allocation5] sm:$0xff] }
  0x26   :  { %144 = vmatprep.subr.mxu0 %v228_v0  ;;  %146 = vmatprep.mubr.msk.f32.mxu0 %vm229_vm0, %v228_v0  ;;  %v39_v2 = vld [vmem:[#allocation2] sm:$0xf]  ;;  %s230_s10 = smov [#allocation7]   ;;  %vm122_vm2 = vcmask 60416  }
  0x27   :  { %145 = vmatpush3.msra.mxu0 %v40_v1  ;;  %v140_v3 = vld [vmem:[%s292_s2] ss:$0 sm:$0xff]  ;;  %s130_s11 = sshll.u32 %s230_s10, 4  ;;  %s131_s11 = int_to_ptr.vmem [resolvable:$true] %s130_s11 }
  0x28   :  { %147 = vmatmul.mubr.msk.f32.vlgmr.msra.gmra.mrb[0].mxu0 %vm48_vm1, %v39_v2  ;;  %s198_s1 = scalar_lea.vmem %s131_s11, 64  ;;  %p203_p3 = scmp.lt.s32.totalorder %s131_s11, %s131_s11 }
  0x29   :  { %p199_p2 = scmp.ne.s32.totalorder %s131_s11, %s198_s1  ;;  %p204_p4 = scmp.lt.s32.totalorder %s198_s1, %s198_s1 }
  0x2b   :  { %p205_p5 = por %p204_p4, %p203_p3 }
  0x2d   :  { %p206_p6 = pnand %p205_p5, %p199_p2 }
  0xfb   :  { %v118_v4 = vpop.f32.mrb[0].mxu0 }
  0xfc   :  { %v119_v5 = vadd.f32 %v140_v3, %v118_v4  ;;  %v148_v6 = vpop.f32.mrb[1].mxu0 }
  0xfe   :  { %123 = vst.msk [vmem:[#allocation7] sm:$0xf] %vm122_vm2, %v119_v5 }
  0xff   :  { %209 = shalt.err (!%p206_p6)
}
 0x100   :  { %s210_s14 = scalar_lea.hbm %s293_s3, 64 }
 0x101   :  { %p211_p7 = scmp.ne.s32.totalorder %s293_s3, %s210_s14  ;;  %p214_p8 = scmp.lt.u32.totalorder %s210_s14, %s293_s3 }
 0x103   :  { %p216_p9 = pnand %p214_p8, %p211_p7 }
 0x105   :  { %219 = shalt.err (!%p216_p9)
}
 0x106   :  { %133 = dma.vmem_to_hbm [thread:$0]  %s131_s11, 64, %s293_s3, [#allocation4]  }
 0x107   :  { %224 = dma.done.wait [#allocation4], 64  }
 0x108   :  { %225 = vsyncadd [#allocation4], 4294967232 }
 0x109   :  { %137 = vsyncpa [#allocation3], 1 }
 0x10a   :  { %138 = vsyncpa [#allocation6], 1 }
 0x10b   :  { %139 = vsyncpa [#allocation4], 1 }

</bundles_post_ra>
